<compile_context>
chip_gen: v5e
topology: v5e:2x2
jax: 0.10.0
libtpu: 0.0.40
codegen_flags: <defaults>
</compile_context>

<pallas_src>
import functools

import jax
import jax.numpy as jnp
from jax.experimental import pallas as pl
from jax.experimental.pallas import tpu as pltpu


# ---------------------------------------------------------------------------
# Kernel 1: ConvTranspose2d with stride == kernel (non-overlapping taps),
# fused with the 0.578 scale.  Pure VPU: Cin broadcast-multiply-accumulates,
# lane axis = N*H*W, no MXU, no masked-lane matmul.
# ---------------------------------------------------------------------------
def _convt2d_vpu_kernel(x_ref, w_ref, b_ref, o_ref, *, scale, cin):
    # x_ref: (Cin, M)   M = N*H*W on the lane axis (lane-dense)
    # w_ref: (R,  Cin)  R = Cout*KH*KW
    # b_ref: (R,  1)
    # o_ref: (R,  M)
    acc = jnp.zeros(o_ref.shape, jnp.float32)
    for ci in range(cin):                     # static unroll: Cin broadcast-MACs
        acc = acc + w_ref[:, ci:ci + 1] * x_ref[ci:ci + 1, :]
    o_ref[...] = (acc + b_ref[...]) * scale   # bias+scale once, in the epilogue


def conv_transpose2d_s2_scaled(x, w, b, scale):
    # stride == kernel  =>  out[n,co,2i+kh,2j+kw] = sum_ci x[n,ci,i,j]*w[ci,co,kh,kw] + b[co]
    N, Cin, H, W = x.shape
    _, Cout, KH, KW = w.shape
    M = N * H * W
    R = Cout * KH * KW
    xmat = jnp.transpose(x, (1, 0, 2, 3)).reshape(Cin, M)      # (Cin, M)
    wmat = jnp.transpose(w, (1, 2, 3, 0)).reshape(R, Cin)      # (R, Cin), rows = (co,kh,kw)
    bcol = jnp.repeat(b, KH * KW).reshape(R, 1)
    kern = functools.partial(_convt2d_vpu_kernel, scale=scale, cin=Cin)
    ymat = pl.pallas_call(
        kern,
        out_shape=jax.ShapeDtypeStruct((R, M), jnp.float32),
        grid=(1,),
        in_specs=[
            pl.BlockSpec((Cin, M), lambda i: (0, 0)),
            pl.BlockSpec((R, Cin), lambda i: (0, 0)),
            pl.BlockSpec((R, 1), lambda i: (0, 0)),
        ],
        out_specs=pl.BlockSpec((R, M), lambda i: (0, 0)),
        compiler_params=pltpu.CompilerParams(
            dimension_semantics=("arbitrary",)),
    )(xmat, wmat, bcol)
    # stride-2 interleave of the non-overlapping taps (tiny: R*M floats, XLA)
    y = ymat.reshape(Cout, KH, KW, N, H, W)
    y = jnp.transpose(y, (3, 0, 4, 1, 5, 2)).reshape(N, Cout, H * KH, W * KW)
    return y


# ---------------------------------------------------------------------------
# Kernel 2: lane-dense bf16 matmul with f32 accumulation, M-tiled parallel grid.
# Used for ConvTranspose3d in its scatter form:
#   Y[(kd,kh,kw,co), (n,d,h,w)] = sum_ci w[ci,co,kd,kh,kw] * x[n,ci,d,h,w]
# ---------------------------------------------------------------------------
def _matmul_f32acc_kernel(w_ref, x_ref, o_ref):
    o_ref[...] = jnp.dot(w_ref[...], x_ref[...],
                         preferred_element_type=jnp.float32)


def conv_transpose3d_k3(x, w, b, *, tile_m=256):
    # x: (N, Cin, D, H, W)   w: (Cin, Cout, KD, KH, KW)   b: (Cout,)
    N, Cin, D, H, W = x.shape
    _, Cout, KD, KH, KW = w.shape
    OD, OH, OW = D + KD - 1, H + KH - 1, W + KW - 1
    Ncol = N * D * H * W                          # lane axis of the matmul (128 here)
    R = KD * KH * KW * Cout                       # row axis: (tap, cout)

    xmat = jnp.transpose(x, (1, 0, 2, 3, 4)).reshape(Cin, Ncol).astype(jnp.bfloat16)
    wmat = jnp.transpose(w, (2, 3, 4, 1, 0)).reshape(R, Cin)
    grid_m = pl.cdiv(R, tile_m)
    Rpad = grid_m * tile_m
    wmat = jnp.pad(wmat, ((0, Rpad - R), (0, 0))).astype(jnp.bfloat16)

    ymat = pl.pallas_call(
        _matmul_f32acc_kernel,
        out_shape=jax.ShapeDtypeStruct((Rpad, Ncol), jnp.float32),
        grid=(grid_m,),
        in_specs=[
            pl.BlockSpec((tile_m, Cin), lambda i: (i, 0)),
            pl.BlockSpec((Cin, Ncol), lambda i: (0, 0)),
        ],
        out_specs=pl.BlockSpec((tile_m, Ncol), lambda i: (i, 0)),
        compiler_params=pltpu.CompilerParams(
            dimension_semantics=("parallel",),     # both TCs on v7x, pipelined DMA
            vmem_limit_bytes=64 * 1024 * 1024),
    )(wmat, xmat)

    # TODO(synk): the col2im overlap-add of the 27 tap slabs (76 KB) and the bias
    # add stay in XLA; at these sizes it is a negligible epilogue.
    y = ymat[:R].reshape(KD, KH, KW, Cout, N, D, H, W)
    out = jnp.zeros((Cout, N, OD, OH, OW), jnp.float32)
    for kd in range(KD):
        for kh in range(KH):
            for kw in range(KW):
                out = out + jnp.pad(
                    y[kd, kh, kw],
                    ((0, 0), (0, 0),
                     (kd, KD - 1 - kd), (kh, KH - 1 - kh), (kw, KW - 1 - kw)))
    out = jnp.transpose(out, (1, 0, 2, 3, 4)) + b[None, :, None, None, None]
    return out


if __name__ == "__main__":
    key = jax.random.PRNGKey(0)
    k1, k2, k3, k4, k5, k6 = jax.random.split(key, 6)

    # ----- x6 path: ConvTranspose2d(11, 3, 2, stride=2)(x2) * 0.578 -----
    N, CIN2, H, W = 3, 11, 8, 8
    COUT2, KS2 = 3, 2
    x2 = jax.random.normal(k1, (N, CIN2, H, W), jnp.float32)
    w2 = jax.random.uniform(k2, (CIN2, COUT2, KS2, KS2), jnp.float32, -0.15, 0.15)
    b2 = jax.random.uniform(k3, (COUT2,), jnp.float32, -0.15, 0.15)
    x6 = conv_transpose2d_s2_scaled(x2, w2, b2, 0.578)

    # pure-XLA reference for the 2D path
    ref6 = (jnp.einsum('ncij,ckab->nkiajb', x2, w2,
                       precision=jax.lax.Precision.HIGHEST)
            .reshape(N, COUT2, H * KS2, W * KS2)
            + b2[None, :, None, None]) * 0.578

    # ----- x7 path: ConvTranspose3d(22, 44, 3) -----
    # TODO(synk): the original forward calls conv_t3 on x2 (11 channels), a
    # channel-mismatch error in PyTorch; the kernel is exercised on a valid
    # 22-channel input instead.
    N3, CIN3, D3, H3, W3 = 2, 22, 4, 4, 4
    COUT3, KS3 = 44, 3
    x3 = jax.random.normal(k4, (N3, CIN3, D3, H3, W3), jnp.float32)
    w3 = jax.random.uniform(k5, (CIN3, COUT3, KS3, KS3, KS3), jnp.float32, -0.05, 0.05)
    b3 = jax.random.uniform(k6, (COUT3,), jnp.float32, -0.05, 0.05)
    x7 = conv_transpose3d_k3(x3, w3, b3)

    # gather-form (correlation on padded input with flipped kernel) reference —
    # independent of the scatter/col2im kernel path.
    OD, OH, OW = D3 + KS3 - 1, H3 + KS3 - 1, W3 + KS3 - 1
    xp = jnp.pad(x3, ((0, 0), (0, 0), (KS3 - 1,) * 2, (KS3 - 1,) * 2, (KS3 - 1,) * 2))
    wf = w3[:, :, ::-1, ::-1, ::-1]
    ref7 = jnp.zeros((N3, COUT3, OD, OH, OW), jnp.float32)
    for kd in range(KS3):
        for kh in range(KS3):
            for kw in range(KS3):
                win = xp[:, :, kd:kd + OD, kh:kh + OH, kw:kw + OW]
                ref7 = ref7 + jnp.einsum('ncdhw,ck->nkdhw', win, wf[:, :, kd, kh, kw],
                                         precision=jax.lax.Precision.HIGHEST)
    ref7 = ref7 + b3[None, :, None, None, None]

    jax.block_until_ready((x6, x7, ref6, ref7))
    assert x6.shape == (N, COUT2, 2 * H, 2 * W) and x6.dtype == jnp.float32
    assert x7.shape == (N3, COUT3, OD, OH, OW) and x7.dtype == jnp.float32
    assert jnp.allclose(x6, ref6, atol=2e-2, rtol=2e-2)
    assert jnp.allclose(x7, ref7, atol=5e-2, rtol=5e-2)   # bf16 matmul tolerance
    print("KERNEL_OK")
</pallas_src>

<mosaic_0001>
module attributes {stable_mosaic.version = 11 : i64} {
  func.func @_convt2d_vpu_kernel(%arg0: i32, %arg1: memref<11x192xf32, #tpu.memory_space<vmem>>, %arg2: memref<12x11xf32, #tpu.memory_space<vmem>>, %arg3: memref<12x1xf32, #tpu.memory_space<vmem>>, %arg4: memref<12x192xf32, #tpu.memory_space<vmem>>) attributes {dimension_semantics = [#tpu.dimension_semantics<arbitrary>], iteration_bounds = array<i64: 1>, scalar_prefetch = 0 : i64, scratch_operands = 0 : i64, tpu.core_type = #tpu.core_type<tc>, window_params = [{pipeline_mode = #tpu.pipeline_mode<synchronous>, transform_indices = @transform_0, window_bounds = array<i64: 11, 192>}, {pipeline_mode = #tpu.pipeline_mode<synchronous>, transform_indices = @transform_1, window_bounds = array<i64: 12, 11>}, {pipeline_mode = #tpu.pipeline_mode<synchronous>, transform_indices = @transform_2, window_bounds = array<i64: 12, 1>}, {pipeline_mode = #tpu.pipeline_mode<synchronous>, transform_indices = @transform_3, window_bounds = array<i64: 12, 192>}]} {
    %cst = arith.constant 0.000000e+00 : f32
    %0 = vector.broadcast %cst : f32 to vector<12x192xf32>
    %c0 = arith.constant 0 : index
    %c0_0 = arith.constant 0 : index
    %1 = vector.load %arg2[%c0, %c0_0] : memref<12x11xf32, #tpu.memory_space<vmem>>, vector<12x1xf32>
    %c0_1 = arith.constant 0 : index
    %c0_2 = arith.constant 0 : index
    %2 = vector.load %arg1[%c0_1, %c0_2] : memref<11x192xf32, #tpu.memory_space<vmem>>, vector<1x192xf32>
    %3 = vector.broadcast %1 : vector<12x1xf32> to vector<12x192xf32>
    %4 = vector.broadcast %2 : vector<1x192xf32> to vector<12x192xf32>
    %5 = arith.mulf %3, %4 : vector<12x192xf32>
    %6 = arith.addf %0, %5 : vector<12x192xf32>
    %c0_3 = arith.constant 0 : index
    %c1 = arith.constant 1 : index
    %7 = vector.load %arg2[%c0_3, %c1] : memref<12x11xf32, #tpu.memory_space<vmem>>, vector<12x1xf32>
    %c1_4 = arith.constant 1 : index
    %c0_5 = arith.constant 0 : index
    %8 = vector.load %arg1[%c1_4, %c0_5] : memref<11x192xf32, #tpu.memory_space<vmem>>, vector<1x192xf32>
    %9 = vector.broadcast %7 : vector<12x1xf32> to vector<12x192xf32>
    %10 = vector.broadcast %8 : vector<1x192xf32> to vector<12x192xf32>
    %11 = arith.mulf %9, %10 : vector<12x192xf32>
    %12 = arith.addf %6, %11 : vector<12x192xf32>
    %c0_6 = arith.constant 0 : index
    %c2 = arith.constant 2 : index
    %13 = vector.load %arg2[%c0_6, %c2] : memref<12x11xf32, #tpu.memory_space<vmem>>, vector<12x1xf32>
    %c2_7 = arith.constant 2 : index
    %c0_8 = arith.constant 0 : index
    %14 = vector.load %arg1[%c2_7, %c0_8] : memref<11x192xf32, #tpu.memory_space<vmem>>, vector<1x192xf32>
    %15 = vector.broadcast %13 : vector<12x1xf32> to vector<12x192xf32>
    %16 = vector.broadcast %14 : vector<1x192xf32> to vector<12x192xf32>
    %17 = arith.mulf %15, %16 : vector<12x192xf32>
    %18 = arith.addf %12, %17 : vector<12x192xf32>
    %c0_9 = arith.constant 0 : index
    %c3 = arith.constant 3 : index
    %19 = vector.load %arg2[%c0_9, %c3] : memref<12x11xf32, #tpu.memory_space<vmem>>, vector<12x1xf32>
    %c3_10 = arith.constant 3 : index
    %c0_11 = arith.constant 0 : index
    %20 = vector.load %arg1[%c3_10, %c0_11] : memref<11x192xf32, #tpu.memory_space<vmem>>, vector<1x192xf32>
    %21 = vector.broadcast %19 : vector<12x1xf32> to vector<12x192xf32>
    %22 = vector.broadcast %20 : vector<1x192xf32> to vector<12x192xf32>
    %23 = arith.mulf %21, %22 : vector<12x192xf32>
    %24 = arith.addf %18, %23 : vector<12x192xf32>
    %c0_12 = arith.constant 0 : index
    %c4 = arith.constant 4 : index
    %25 = vector.load %arg2[%c0_12, %c4] : memref<12x11xf32, #tpu.memory_space<vmem>>, vector<12x1xf32>
    %c4_13 = arith.constant 4 : index
    %c0_14 = arith.constant 0 : index
    %26 = vector.load %arg1[%c4_13, %c0_14] : memref<11x192xf32, #tpu.memory_space<vmem>>, vector<1x192xf32>
    %27 = vector.broadcast %25 : vector<12x1xf32> to vector<12x192xf32>
    %28 = vector.broadcast %26 : vector<1x192xf32> to vector<12x192xf32>
    %29 = arith.mulf %27, %28 : vector<12x192xf32>
    %30 = arith.addf %24, %29 : vector<12x192xf32>
    %c0_15 = arith.constant 0 : index
    %c5 = arith.constant 5 : index
    %31 = vector.load %arg2[%c0_15, %c5] : memref<12x11xf32, #tpu.memory_space<vmem>>, vector<12x1xf32>
    %c5_16 = arith.constant 5 : index
    %c0_17 = arith.constant 0 : index
    %32 = vector.load %arg1[%c5_16, %c0_17] : memref<11x192xf32, #tpu.memory_space<vmem>>, vector<1x192xf32>
    %33 = vector.broadcast %31 : vector<12x1xf32> to vector<12x192xf32>
    %34 = vector.broadcast %32 : vector<1x192xf32> to vector<12x192xf32>
    %35 = arith.mulf %33, %34 : vector<12x192xf32>
    %36 = arith.addf %30, %35 : vector<12x192xf32>
    %c0_18 = arith.constant 0 : index
    %c6 = arith.constant 6 : index
    %37 = vector.load %arg2[%c0_18, %c6] : memref<12x11xf32, #tpu.memory_space<vmem>>, vector<12x1xf32>
    %c6_19 = arith.constant 6 : index
    %c0_20 = arith.constant 0 : index
    %38 = vector.load %arg1[%c6_19, %c0_20] : memref<11x192xf32, #tpu.memory_space<vmem>>, vector<1x192xf32>
    %39 = vector.broadcast %37 : vector<12x1xf32> to vector<12x192xf32>
    %40 = vector.broadcast %38 : vector<1x192xf32> to vector<12x192xf32>
    %41 = arith.mulf %39, %40 : vector<12x192xf32>
    %42 = arith.addf %36, %41 : vector<12x192xf32>
    %c0_21 = arith.constant 0 : index
    %c7 = arith.constant 7 : index
    %43 = vector.load %arg2[%c0_21, %c7] : memref<12x11xf32, #tpu.memory_space<vmem>>, vector<12x1xf32>
    %c7_22 = arith.constant 7 : index
    %c0_23 = arith.constant 0 : index
    %44 = vector.load %arg1[%c7_22, %c0_23] : memref<11x192xf32, #tpu.memory_space<vmem>>, vector<1x192xf32>
    %45 = vector.broadcast %43 : vector<12x1xf32> to vector<12x192xf32>
    %46 = vector.broadcast %44 : vector<1x192xf32> to vector<12x192xf32>
    %47 = arith.mulf %45, %46 : vector<12x192xf32>
    %48 = arith.addf %42, %47 : vector<12x192xf32>
    %c0_24 = arith.constant 0 : index
    %c8 = arith.constant 8 : index
    %49 = vector.load %arg2[%c0_24, %c8] : memref<12x11xf32, #tpu.memory_space<vmem>>, vector<12x1xf32>
    %c8_25 = arith.constant 8 : index
    %c0_26 = arith.constant 0 : index
    %50 = vector.load %arg1[%c8_25, %c0_26] : memref<11x192xf32, #tpu.memory_space<vmem>>, vector<1x192xf32>
    %51 = vector.broadcast %49 : vector<12x1xf32> to vector<12x192xf32>
    %52 = vector.broadcast %50 : vector<1x192xf32> to vector<12x192xf32>
    %53 = arith.mulf %51, %52 : vector<12x192xf32>
    %54 = arith.addf %48, %53 : vector<12x192xf32>
    %c0_27 = arith.constant 0 : index
    %c9 = arith.constant 9 : index
    %55 = vector.load %arg2[%c0_27, %c9] : memref<12x11xf32, #tpu.memory_space<vmem>>, vector<12x1xf32>
    %c9_28 = arith.constant 9 : index
    %c0_29 = arith.constant 0 : index
    %56 = vector.load %arg1[%c9_28, %c0_29] : memref<11x192xf32, #tpu.memory_space<vmem>>, vector<1x192xf32>
    %57 = vector.broadcast %55 : vector<12x1xf32> to vector<12x192xf32>
    %58 = vector.broadcast %56 : vector<1x192xf32> to vector<12x192xf32>
    %59 = arith.mulf %57, %58 : vector<12x192xf32>
    %60 = arith.addf %54, %59 : vector<12x192xf32>
    %c0_30 = arith.constant 0 : index
    %c10 = arith.constant 10 : index
    %61 = vector.load %arg2[%c0_30, %c10] : memref<12x11xf32, #tpu.memory_space<vmem>>, vector<12x1xf32>
    %c10_31 = arith.constant 10 : index
    %c0_32 = arith.constant 0 : index
    %62 = vector.load %arg1[%c10_31, %c0_32] : memref<11x192xf32, #tpu.memory_space<vmem>>, vector<1x192xf32>
    %63 = vector.broadcast %61 : vector<12x1xf32> to vector<12x192xf32>
    %64 = vector.broadcast %62 : vector<1x192xf32> to vector<12x192xf32>
    %65 = arith.mulf %63, %64 : vector<12x192xf32>
    %66 = arith.addf %60, %65 : vector<12x192xf32>
    %c0_33 = arith.constant 0 : index
    %c0_34 = arith.constant 0 : index
    %67 = vector.load %arg3[%c0_33, %c0_34] : memref<12x1xf32, #tpu.memory_space<vmem>>, vector<12x1xf32>
    %68 = vector.broadcast %67 : vector<12x1xf32> to vector<12x192xf32>
    %69 = arith.addf %66, %68 : vector<12x192xf32>
    %cst_35 = arith.constant 5.780000e-01 : f32
    %70 = vector.broadcast %cst_35 : f32 to vector<12x192xf32>
    %71 = arith.mulf %69, %70 : vector<12x192xf32>
    %c0_36 = arith.constant 0 : index
    %c0_37 = arith.constant 0 : index
    %72 = vector.load %arg4[%c0_36, %c0_37] : memref<12x192xf32, #tpu.memory_space<vmem>>, vector<12x192xf32>
    tpu.vector_store %arg4[%c0_36, %c0_37], %71 {strides = array<i32>} : memref<12x192xf32, #tpu.memory_space<vmem>>, vector<12x192xf32>,
    return
  }
  func.func @transform_0(%arg0: i32) -> (i32, i32) {
    %c0_i32 = arith.constant 0 : i32
    %c0_i32_0 = arith.constant 0 : i32
    %c0_i32_1 = arith.constant 0 : i32
    return %c0_i32, %c0_i32_0 : i32, i32
  }
  func.func @transform_1(%arg0: i32) -> (i32, i32) {
    %c0_i32 = arith.constant 0 : i32
    %c0_i32_0 = arith.constant 0 : i32
    %c0_i32_1 = arith.constant 0 : i32
    return %c0_i32, %c0_i32_0 : i32, i32
  }
  func.func @transform_2(%arg0: i32) -> (i32, i32) {
    %c0_i32 = arith.constant 0 : i32
    %c0_i32_0 = arith.constant 0 : i32
    %c0_i32_1 = arith.constant 0 : i32
    return %c0_i32, %c0_i32_0 : i32, i32
  }
  func.func @transform_3(%arg0: i32) -> (i32, i32) {
    %c0_i32 = arith.constant 0 : i32
    %c0_i32_0 = arith.constant 0 : i32
    %c0_i32_1 = arith.constant 0 : i32
    return %c0_i32, %c0_i32_0 : i32, i32
  }
}

</mosaic_0001>

<bundles_post_ra>
// kernel: tpu_custom_call.1
= control target key start
LH: loop header
LB: loop body
LE: loop exit
PB: predicated region body
PF: predicated region fallthrough
CT: control target
= control target key end

     0   :  { %8 = vsyncpa [#allocation3], 0  ;;  %s496_s0 = inlined_call_operand.hbm [shape: f32[11,192], index: 0, kind: input, shape index: {}]   ;;  %s497_s1 = inlined_call_operand.vmem [shape: f32[12,11], index: 1, kind: input, shape index: {}]   ;;  %s498_s2 = inlined_call_operand.vmem [shape: f32[12,1], index: 2, kind: input, shape index: {}]   ;;  %s499_s3 = inlined_call_operand.hbm [shape: f32[12,192], index: 3, kind: output, shape index: {}]  }
   0x1   :  { %9 = vsyncpa [#allocation4], 0  ;;  %s14_s14 = sshll.u32 %s496_s0, 4  ;;  %s421_s15 = smov [#allocation2]   ;;  %s15_s14 = int_to_ptr.hbm [resolvable:$true] %s14_s14 }
   0x2   :  { %s16_s16 = sshll.u32 %s421_s15, 4  ;;  %s422_s17 = smov 256   ;;  %s17_s16 = int_to_ptr.vmem [resolvable:$true] %s16_s16 }
   0x3   :  { %s423_s18 = smov 16  }
   0x4   :  { %22 = dma.hbm_to_vmem [thread:$0]  %s15_s14, 512, %s17_s16, [#allocation3], %s422_s17, %s422_s17, %s423_s18  }
   0x5   :  { %417 = dma.done.wait [#allocation3], 512  }
   0x6   :  { %418 = vsyncadd [#allocation3], 4294966784  ;;  %v424_v0 = vmov 1   ;;  %v425_v1 = vmov 0   ;;  %v426_v2 = vmov 2   ;;  %v31_v3 = vld [vmem:[%s497_s1] sm:$0xff] }
   0x7   :  { %348 = vset.pattern.permute.xlu1 %v424_v0  ;;  %347 = vset.pattern.permute.xlu0 %v425_v1  ;;  %v32_v4 = vld [vmem:[%s497_s1 + $0x8] sm:$0xf]  ;;  %v427_v5 = vmov 3   ;;  %v428_v6 = vmov 4   ;;  %v429_v7 = vmov 5   ;;  %v430_v8 = vmov 6  }
   0x8   :  { %349 = vset.pattern.permute.xlu2 %v426_v2  ;;  %60 = vperm.xlu1 %348, %v31_v3   ;;  %v431_v9 = vmov 8   ;;  %v432_v10 = vmov 7   ;;  %v433_v11 = vmov 10   ;;  %v434_v12 = vmov 9   ;;  %v287_v13 = vld [vmem:[%s498_s2] sm:$0xff]  ;;  %s319_s28 = sshll.u32 %s499_s3, 4  ;;  %s320_s28 = int_to_ptr.hbm [resolvable:$true] %s319_s28 }
   0x9   :  { %36 = vperm.xlu0 %347, %v31_v3   ;;  %83 = vperm.xlu2 %349, %v31_v3   ;;  %v288_v14 = vld [vmem:[%s498_s2 + $0x8] sm:$0xf]  ;;  %v127_v46 = vld [vmem:[#allocation2 + $0x4] ss:$8 sm:$0x3]  ;;  %vm311_vm0 = vcmask 519168  }
   0xa   :  { %v58_v25 = vld [vmem:[#allocation2 + $0x1] ss:$8 sm:$0x3]  ;;  %v33_v26 = vld [vmem:[#allocation2] ss:$8 sm:$0x3] }
   0xb   :  { %v81_v28 = vld [vmem:[#allocation2 + $0x2] ss:$8 sm:$0x3]  ;;  %v68_v29 = vperm.slane %v58_v25, 0  ;;  %v69_v30 = vperm.slane %v58_v25, 1  ;;  %v45_v31 = vperm.slane %v33_v26, 0 }
   0xc   :  { %v46_v32 = vperm.slane %v33_v26, 1  ;;  %v91_v33 = vperm.slane %v81_v28, 0  ;;  %v104_v34 = vld [vmem:[#allocation2 + $0x3] ss:$8 sm:$0x3]  ;;  %v92_v45 = vperm.slane %v81_v28, 1 }
   0xd   :  { %v114_v47 = vperm.slane %v104_v34, 0  ;;  %v115_v48 = vperm.slane %v104_v34, 1  ;;  %v137_v52 = vperm.slane %v127_v46, 0  ;;  %v138_v53 = vperm.slane %v127_v46, 1  ;;  %s435_s2 = smov [#allocation5]  }
   0xe   :  { %v150_v62 = vld [vmem:[#allocation2 + $0x5] ss:$8 sm:$0x3]  ;;  %s317_s25 = sshll.u32 %s435_s2, 4  ;;  %vm308_vm1 = vcmask 523264   ;;  %s318_s25 = int_to_ptr.vmem [resolvable:$true] %s317_s25 }
  0x10   :  { %64 = vperm.xlu1 %348, %v32_v4  }
  0x11   :  { %41 = vperm.xlu0 %347, %v32_v4   ;;  %87 = vperm.xlu2 %349, %v32_v4  }
  0x18   :  { %351 = vset.pattern.permute.xlu1 %v427_v5 }
  0x19   :  { %350 = vset.pattern.permute.xlu0 %v427_v5  ;;  %110 = vperm.xlu1 %351, %v32_v4  }
  0x1a   :  { %106 = vperm.xlu0 %350, %v31_v3   ;;  %352 = vset.pattern.permute.xlu2 %v428_v6 }
  0x1b   :  { %129 = vperm.xlu2 %352, %v31_v3  }
  0x21   :  { %353 = vset.pattern.permute.xlu1 %v428_v6 }
  0x22   :  { %355 = vset.pattern.permute.xlu0 %v429_v7  ;;  %133 = vperm.xlu1 %353, %v32_v4  }
  0x23   :  { %156 = vperm.xlu0 %355, %v32_v4   ;;  %354 = vset.pattern.permute.xlu2 %v429_v7  ;;  %v173_v7 = vld [vmem:[#allocation2 + $0x6] ss:$8 sm:$0x3] }
  0x24   :  { %152 = vperm.xlu2 %354, %v31_v3  }
  0x2a   :  { %356 = vset.pattern.permute.xlu1 %v430_v8 }
  0x2b   :  { %360 = vset.pattern.permute.xlu0 %v431_v9  ;;  %175 = vperm.xlu1 %356, %v31_v3  }
  0x2c   :  { %221 = vperm.xlu0 %360, %v31_v3   ;;  %357 = vset.pattern.permute.xlu2 %v430_v8 }
  0x2d   :  { %179 = vperm.xlu2 %357, %v32_v4  }
  0x33   :  { %358 = vset.pattern.permute.xlu1 %v432_v10 }
  0x34   :  { %365 = vset.pattern.permute.xlu0 %v433_v11  ;;  %198 = vperm.xlu1 %358, %v31_v3  }
  0x35   :  { %271 = vperm.xlu0 %365, %v32_v4   ;;  %359 = vset.pattern.permute.xlu2 %v432_v10  ;;  %v160_v10 = vperm.slane %v150_v62, 0 }
  0x36   :  { %202 = vperm.xlu2 %359, %v32_v4  }
  0x3c   :  { %361 = vset.pattern.permute.xlu1 %v431_v9 }
  0x3d   :  { %368 = vset.pattern.permute.xlu0 %v425_v1  ;;  %225 = vperm.xlu1 %361, %v32_v4  }
  0x3e   :  { %362 = vset.pattern.permute.xlu2 %v434_v12 }
  0x3f   :  { %244 = vperm.xlu2 %362, %v31_v3  }
  0x45   :  { %363 = vset.pattern.permute.xlu1 %v434_v12 }
  0x46   :  { %248 = vperm.xlu1 %363, %v32_v4  }
  0x47   :  { %364 = vset.pattern.permute.xlu2 %v433_v11  ;;  %v161_v11 = vperm.slane %v150_v62, 1 }
  0x48   :  { %267 = vperm.xlu2 %364, %v31_v3  }
  0x4e   :  { %366 = vset.pattern.permute.xlu1 %v425_v1 }
  0x4f   :  { %291 = vperm.xlu1 %366, %v287_v13  }
  0x50   :  { %367 = vset.pattern.permute.xlu2 %v425_v1 }
  0x51   :  { %296 = vperm.xlu2 %367, %v288_v14  }
  0x63   :  { %v84_v15 = vpop.permute.xlu2 %83 }
  0x64   :  { %v95_v56 = vmul.f32 %v91_v33, %v84_v15  ;;  %v96_v57 = vmul.f32 %v92_v45, %v84_v15 }
  0x6b   :  { %v88_v16 = vpop.permute.xlu2 %87 }
  0x6c   :  { %v97_v60 = vmul.f32 %v91_v33, %v88_v16  ;;  %v98_v61 = vmul.f32 %v92_v45, %v88_v16  ;;  %v242_v45 = vld [vmem:[#allocation2 + $0x11] ss:$8 sm:$0x3] }
  0x75   :  { %v130_v19 = vpop.permute.xlu2 %129 }
  0x76   :  { %v142_v16 = vmul.f32 %v138_v53, %v130_v19 }
  0x7a   :  { %v61_v17 = vpop.permute.xlu1 %60 }
  0x7b   :  { %v37_v20 = vpop.permute.xlu0 %36  ;;  %v72_v37 = vmul.f32 %v68_v29, %v61_v17  ;;  %v73_v38 = vmul.f32 %v69_v30, %v61_v17  ;;  %v141_v17 = vmul.f32 %v137_v52, %v130_v19 }
  0x7c   :  { %v49_v39 = vmul.f32 %v45_v31, %v37_v20  ;;  %v50_v40 = vmul.f32 %v46_v32, %v37_v20  ;;  %v184_v20 = vperm.slane %v173_v7, 1 }
  0x7e   :  { %v474_v22 = vpop.permute.xlu2 %152  ;;  %v76_v49 = vadd.f32 %v72_v37, %v49_v39  ;;  %v77_v50 = vadd.f32 %v73_v38, %v50_v40 }
  0x80   :  { %v99_v2 = vadd.f32 %v95_v56, %v76_v49  ;;  %v100_v3 = vadd.f32 %v96_v57, %v77_v50 }
  0x82   :  { %v65_v18 = vpop.permute.xlu1 %64 }
  0x83   :  { %v42_v23 = vpop.permute.xlu0 %41  ;;  %v74_v41 = vmul.f32 %v68_v29, %v65_v18  ;;  %v75_v42 = vmul.f32 %v69_v30, %v65_v18  ;;  %v183_v18 = vperm.slane %v173_v7, 0  ;;  %v219_v30 = vld [vmem:[#allocation2 + $0x10] ss:$8 sm:$0x3] }
  0x84   :  { %v51_v43 = vmul.f32 %v45_v31, %v42_v23  ;;  %v52_v44 = vmul.f32 %v46_v32, %v42_v23  ;;  %v164_v31 = vmul.f32 %v160_v10, %v474_v22  ;;  %v229_v39 = vperm.slane %v219_v30, 0 }
  0x85   :  { %v230_v40 = vperm.slane %v219_v30, 1 }
  0x86   :  { %v78_v54 = vadd.f32 %v74_v41, %v51_v43  ;;  %v79_v55 = vadd.f32 %v75_v42, %v52_v44 }
  0x87   :  { %v476_v27 = vpop.permute.xlu2 %179 }
  0x88   :  { %v101_v5 = vadd.f32 %v97_v60, %v78_v54  ;;  %v102_v6 = vadd.f32 %v98_v61, %v79_v55  ;;  %v189_v41 = vmul.f32 %v183_v18, %v476_v27  ;;  %v190_v42 = vmul.f32 %v184_v20, %v476_v27 }
  0x89   :  { %v253_v54 = vperm.slane %v242_v45, 1 }
  0x8b   :  { %v111_v21 = vpop.permute.xlu1 %110 }
  0x8c   :  { %v107_v35 = vpop.permute.xlu0 %106  ;;  %v120_v63 = vmul.f32 %v114_v47, %v111_v21  ;;  %v121_v0 = vmul.f32 %v115_v48, %v111_v21  ;;  %v196_v21 = vld [vmem:[#allocation2 + $0x7] ss:$8 sm:$0x3] }
  0x8d   :  { %v118_v58 = vmul.f32 %v114_v47, %v107_v35  ;;  %v119_v59 = vmul.f32 %v115_v48, %v107_v35  ;;  %v206_v34 = vperm.slane %v196_v21, 0  ;;  %v207_v35 = vperm.slane %v196_v21, 1 }
  0x8e   :  { %v124_v14 = vadd.f32 %v120_v63, %v101_v5  ;;  %v125_v15 = vadd.f32 %v121_v0, %v102_v6 }
  0x8f   :  { %v122_v12 = vadd.f32 %v118_v58, %v99_v2  ;;  %v123_v13 = vadd.f32 %v119_v59, %v100_v3  ;;  %v265_v58 = vld [vmem:[#allocation2 + $0x12] ss:$8 sm:$0x3] }
  0x90   :  { %v480_v51 = vpop.permute.xlu2 %202  ;;  %v275_v2 = vperm.slane %v265_v58, 0  ;;  %v276_v3 = vperm.slane %v265_v58, 1 }
  0x91   :  { %v145_v32 = vadd.f32 %v141_v17, %v122_v12  ;;  %v146_v33 = vadd.f32 %v142_v16, %v123_v13  ;;  %v212_v56 = vmul.f32 %v206_v34, %v480_v51  ;;  %v213_v57 = vmul.f32 %v207_v35, %v480_v51 }
  0x94   :  { %v134_v24 = vpop.permute.xlu1 %133 }
  0x95   :  { %v157_v1 = vpop.permute.xlu0 %156  ;;  %v143_v8 = vmul.f32 %v137_v52, %v134_v24  ;;  %v144_v9 = vmul.f32 %v138_v53, %v134_v24  ;;  %v165_v24 = vmul.f32 %v161_v11, %v474_v22  ;;  %v168_v22 = vadd.f32 %v164_v31, %v145_v32 }
  0x96   :  { %v166_v28 = vmul.f32 %v160_v10, %v157_v1  ;;  %v167_v29 = vmul.f32 %v161_v11, %v157_v1  ;;  %v252_v53 = vperm.slane %v242_v45, 0 }
  0x97   :  { %v147_v25 = vadd.f32 %v143_v8, %v124_v14  ;;  %v148_v26 = vadd.f32 %v144_v9, %v125_v15  ;;  %v169_v47 = vadd.f32 %v165_v24, %v146_v33 }
  0x99   :  { %v245_v23 = vpop.permute.xlu2 %244  ;;  %v170_v43 = vadd.f32 %v166_v28, %v147_v25  ;;  %v171_v44 = vadd.f32 %v167_v29, %v148_v26 }
  0x9a   :  { %v256_v6 = vmul.f32 %v252_v53, %v245_v23  ;;  %v257_v7 = vmul.f32 %v253_v54, %v245_v23 }
  0x9b   :  { %v193_v55 = vadd.f32 %v189_v41, %v170_v43 }
  0x9d   :  { %v478_v36 = vpop.permute.xlu1 %175 }
  0x9e   :  { %v222_v37 = vpop.permute.xlu0 %221  ;;  %v187_v19 = vmul.f32 %v183_v18, %v478_v36  ;;  %v188_v38 = vmul.f32 %v184_v20, %v478_v36  ;;  %v194_v36 = vadd.f32 %v190_v42, %v171_v44 }
  0x9f   :  { %v233_v60 = vmul.f32 %v229_v39, %v222_v37  ;;  %v234_v61 = vmul.f32 %v230_v40, %v222_v37 }
  0xa0   :  { %v191_v50 = vadd.f32 %v187_v19, %v168_v22  ;;  %v192_v52 = vadd.f32 %v188_v38, %v169_v47  ;;  %v217_v5 = vadd.f32 %v213_v57, %v194_v36 }
  0xa2   :  { %v268_v62 = vpop.permute.xlu2 %267 }
  0xa3   :  { %v279_v18 = vmul.f32 %v275_v2, %v268_v62  ;;  %v280_v20 = vmul.f32 %v276_v3, %v268_v62 }
  0xa6   :  { %v199_v4 = vpop.permute.xlu1 %198 }
  0xa7   :  { %v210_v48 = vmul.f32 %v206_v34, %v199_v4  ;;  %v211_v49 = vmul.f32 %v207_v35, %v199_v4  ;;  %v272_v1 = vpop.permute.xlu0 %271  ;;  %v216_v4 = vadd.f32 %v212_v56, %v193_v55 }
  0xa8   :  { %v281_v11 = vmul.f32 %v275_v2, %v272_v1  ;;  %v282_v51 = vmul.f32 %v276_v3, %v272_v1 }
  0xa9   :  { %v214_v27 = vadd.f32 %v210_v48, %v191_v50  ;;  %v215_v59 = vadd.f32 %v211_v49, %v192_v52 }
  0xab   :  { %v237_v8 = vadd.f32 %v233_v60, %v214_v27  ;;  %v238_v9 = vadd.f32 %v234_v61, %v215_v59  ;;  %v297_v21 = vpop.permute.xlu2 %296 }
  0xad   :  { %v260_v25 = vadd.f32 %v256_v6, %v237_v8  ;;  %v261_v26 = vadd.f32 %v257_v7, %v238_v9 }
  0xaf   :  { %v226_v46 = vpop.permute.xlu1 %225  ;;  %v283_v31 = vadd.f32 %v279_v18, %v260_v25  ;;  %v284_v24 = vadd.f32 %v280_v20, %v261_v26 }
  0xb0   :  { %v235_v63 = vmul.f32 %v229_v39, %v226_v46  ;;  %v236_v0 = vmul.f32 %v230_v40, %v226_v46 }
  0xb2   :  { %v239_v12 = vadd.f32 %v235_v63, %v216_v4  ;;  %v240_v13 = vadd.f32 %v236_v0, %v217_v5 }
  0xb8   :  { %v249_v10 = vpop.permute.xlu1 %248 }
  0xb9   :  { %v258_v14 = vmul.f32 %v252_v53, %v249_v10  ;;  %v259_v15 = vmul.f32 %v253_v54, %v249_v10 }
  0xbb   :  { %v262_v17 = vadd.f32 %v258_v14, %v239_v12  ;;  %v263_v16 = vadd.f32 %v259_v15, %v240_v13 }
  0xbd   :  { %v285_v28 = vadd.f32 %v281_v11, %v262_v17  ;;  %v286_v29 = vadd.f32 %v282_v51, %v263_v16 }
  0xbf   :  { %v301_v30 = vadd.f32 %v297_v21, %v285_v28  ;;  %v302_v23 = vadd.f32 %v297_v21, %v286_v29 }
  0xc1   :  { %v305_v32 = vmul.f32 0.578, %v301_v30  ;;  %v306_v33 = vmul.f32 0.578, %v302_v23  ;;  %v292_v34 = vpop.permute.xlu1 %291 }
  0xc2   :  { %v299_v35 = vadd.f32 %v292_v34, %v283_v31  ;;  %v300_v37 = vadd.f32 %v292_v34, %v284_v24 }
  0xc3   :  { %310 = vst [vmem:[#allocation5 + $0x10] sm:$0xf] %v305_v32 }
  0xc4   :  { %312 = vst.msk [vmem:[#allocation5 + $0x18] sm:$0xf] %vm311_vm0, %v306_v33  ;;  %v303_v19 = vmul.f32 0.578, %v299_v35  ;;  %v304_v38 = vmul.f32 0.578, %v300_v37 }
  0xc6   :  { %307 = vst [vmem:[#allocation5] sm:$0xff] %v303_v19 }
  0xc7   :  { %309 = vst.msk [vmem:[#allocation5 + $0x8] sm:$0xff] %vm308_vm1, %v304_v38 }
  0xc8   :  { %325 = dma.vmem_to_hbm [thread:$0]  %s318_s25, 512, %s320_s28, [#allocation4], %s422_s17, %s422_s17, %s423_s18  }
  0xc9   :  { %419 = dma.done.wait [#allocation4], 512  }
  0xca   :  { %420 = vsyncadd [#allocation4], 4294966784 }
  0xcb   :  { %330 = vsyncpa [#allocation3], 1 }
  0xcc   :  { %331 = vsyncpa [#allocation4], 1 }

</bundles_post_ra>
